<compile_context>
chip_gen: v6e
topology: v6e:2x2x1
jax: 0.10.0
libtpu: 0.0.40
codegen_flags: <defaults>
</compile_context>

<pallas_src>
import functools
import math

import jax
import jax.numpy as jnp
from jax.experimental import pallas as pl
from jax.experimental.pallas import tpu as pltpu


def _round_up(x, m):
    return ((x + m - 1) // m) * m


def _cdiv(a, b):
    return (a + b - 1) // b


def _pick_tile(batch, tile_b):
    """Pick a lane-aligned batch tile and padded batch size.

    Ensures TILE_B is a multiple of 128 (lane axis) and that there are at least
    two parallel grid steps whenever the batch allows, so both v7x TensorCores
    are used.  Also rebalances the tile so padding waste stays small.
    """
    lane = 128
    b_pad = _round_up(batch, lane)
    tb = max(lane, min(_round_up(tile_b, lane), b_pad))
    n_steps = _cdiv(b_pad, tb)
    if n_steps < 2 and b_pad >= 2 * lane:
        n_steps = 2                       # keep both v7x TensorCores busy
    tb = _round_up(_cdiv(b_pad, n_steps), lane)
    return tb, tb * n_steps


def _regret_kernel(n_agents, n_items, hidden, pay_off,
                   reports_ref, w0_ref, wrest_ref, ball_ref, rep_ref, sel_ref,
                   out_ref):
    A, I, H = n_agents, n_items, hidden
    AS = (A + 1) * I                                   # allocation-head width

    x = reports_ref[...]                               # (A*I, TB)  feature-major

    b0 = ball_ref[0:H, :]                              # (H, 1) column biases
    b1 = ball_ref[H:2 * H, :]
    b2 = ball_ref[2 * H:3 * H, :]
    bh = ball_ref[3 * H:, :]                           # (head_rows, 1)

    # Shared trunk: (Linear + Tanh) x 3, feature-major (W^T @ x).
    h = jnp.tanh(jnp.dot(w0_ref[...], x,
                         preferred_element_type=jnp.float32) + b0)
    h = jnp.tanh(jnp.dot(wrest_ref[0:H, :], h,
                         preferred_element_type=jnp.float32) + b1)
    h = jnp.tanh(jnp.dot(wrest_ref[H:2 * H, :], h,
                         preferred_element_type=jnp.float32) + b2)

    # Fused allocation + payment head (payment rows start at pay_off, 8-aligned).
    head = jnp.dot(wrest_ref[2 * H:, :], h,
                   preferred_element_type=jnp.float32) + bh       # (head_rows, TB)
    alloc_logits = head[0:AS, :]                        # ((A+1)*I, TB)
    pay_logits = head[pay_off:pay_off + A, :]           # (A, TB)  aligned slice

    # Softmax over the agent axis (agent-major sublane blocks of size I).
    m = head[0:I, :]
    for a in range(1, A + 1):
        m = jnp.maximum(m, head[a * I:(a + 1) * I, :])            # (I, TB)
    # Broadcast per-item max to all A+1 agents via a tiny resident matmul, then
    # ONE wide exp over the whole block (lane-dense EUP work).
    m_full = jnp.dot(rep_ref[...], m,
                     preferred_element_type=jnp.float32)          # (AS, TB)
    exps = jnp.exp(alloc_logits - m_full)                         # (AS, TB)
    denom = exps[0:I, :]
    for a in range(1, A + 1):
        denom = denom + exps[a * I:(a + 1) * I, :]                # (I, TB)
    inv = 1.0 / denom                                             # exact: 1e-5 match
    inv_full = jnp.dot(rep_ref[0:A * I, :], inv,
                       preferred_element_type=jnp.float32)        # (A*I, TB)

    # View_Cut: drop the dummy agent; single lane-dense store.
    allocs = exps[0:A * I, :] * inv_full                          # (A*I, TB)
    out_ref[0:A * I, :] = allocs

    # payments = sigmoid(pay_logits) * sum_items(allocs * reports)  (per agent)
    utils = jnp.dot(sel_ref[...], allocs * x,
                    preferred_element_type=jnp.float32)           # (A, TB)
    out_ref[A * I:, :] = jax.nn.sigmoid(pay_logits) * utils


def regret_net_forward(reports, params, n_agents, n_items, tile_b=4096):
    """reports: (B, n_agents, n_items) float32 -> (allocs (B,A,I), payments (B,A))."""
    B = reports.shape[0]
    A, I = n_agents, n_items
    in_size = A * I
    AS = (A + 1) * I
    hidden = params["w0"].shape[1]
    pay_off = _round_up(AS, 8)            # payment rows start on an 8-sublane boundary
    head_rows = pay_off + A

    # ---- Host-side parameter prep (transposed / fused / resident constants) ----
    w0_t = params["w0"].T.astype(jnp.float32)                         # (H, A*I)
    wh_t = jnp.zeros((head_rows, hidden), jnp.float32)
    wh_t = wh_t.at[:AS, :].set(params["wa"].T)
    wh_t = wh_t.at[pay_off:pay_off + A, :].set(params["wp"].T)
    w_rest = jnp.concatenate([params["w1"].T, params["w2"].T, wh_t],
                             axis=0).astype(jnp.float32)              # (2H+head_rows, H)

    bh_col = jnp.zeros((head_rows, 1), jnp.float32)
    bh_col = bh_col.at[:AS, :].set(params["ba"].T)
    bh_col = bh_col.at[pay_off:pay_off + A, :].set(params["bp"].T)
    b_all = jnp.concatenate([params["b0"].T, params["b1"].T, params["b2"].T,
                             bh_col], axis=0).astype(jnp.float32)     # (3H+head_rows, 1)

    # rep_t[a*I+i, i] = 1 : broadcasts a per-item row block across agents.
    rep_t = ((jnp.arange(AS)[:, None] % I) ==
             jnp.arange(I)[None, :]).astype(jnp.float32)              # (AS, I)
    # sel_t[a, a*I+i] = 1 : per-agent sum over items.
    sel_t = (jnp.arange(A)[:, None] ==
             (jnp.arange(A * I)[None, :] // I)).astype(jnp.float32)   # (A, A*I)

    # ---- Lane-dense input layout: (features, batch), batch padded to tile ----
    tb, Bp = _pick_tile(B, tile_b)
    reports_t = reports.reshape(B, in_size).T.astype(jnp.float32)     # (A*I, B)
    if Bp != B:
        reports_t = jnp.pad(reports_t, ((0, 0), (0, Bp - B)))
    grid = (Bp // tb,)

    def batch_spec(nrow):
        return pl.BlockSpec((nrow, tb), lambda i: (0, i))

    def const_spec(shape):
        return pl.BlockSpec(shape, lambda i: (0, 0))      # resident across grid

    out_rows = A * I + A

    # Advisory cost estimate for XLA scheduling.
    flops = int(2 * Bp * (in_size * hidden + 2 * hidden * hidden
                          + hidden * head_rows + AS * I + A * I * I + A * A * I))
    transcendentals = int(Bp * (3 * hidden + AS + A))
    weight_bytes = 4 * (w0_t.size + w_rest.size + b_all.size
                        + rep_t.size + sel_t.size)
    bytes_accessed = int(4 * Bp * (in_size + out_rows) + weight_bytes)

    kernel = functools.partial(_regret_kernel, A, I, hidden, pay_off)
    out = pl.pallas_call(
        kernel,
        grid=grid,
        in_specs=[
            batch_spec(in_size),
            const_spec(w0_t.shape),
            const_spec(w_rest.shape),
            const_spec(b_all.shape),
            const_spec(rep_t.shape),
            const_spec(sel_t.shape),
        ],
        out_specs=batch_spec(out_rows),
        out_shape=jax.ShapeDtypeStruct((out_rows, Bp), jnp.float32),
        compiler_params=pltpu.CompilerParams(
            dimension_semantics=("parallel",)),
        cost_estimate=pl.CostEstimate(
            flops=flops,
            transcendentals=transcendentals,
            bytes_accessed=bytes_accessed),
    )(reports_t, w0_t, w_rest, b_all, rep_t, sel_t)

    allocs = out[:A * I, :B].T.reshape(B, A, I)
    payments = out[A * I:, :B].T
    return allocs, payments


def glorot(key, shape):
    fan_in, fan_out = shape
    limit = math.sqrt(6.0 / (fan_in + fan_out))
    return jax.random.uniform(key, shape, jnp.float32, -limit, limit)


def make_params(key, n_agents, n_items, hidden):
    input_size = n_agents * n_items
    alloc_size = (n_agents + 1) * n_items
    keys = jax.random.split(key, 10)
    return {
        "w0": glorot(keys[0], (input_size, hidden)),
        "b0": jax.random.uniform(keys[1], (1, hidden), jnp.float32, -0.1, 0.1),
        "w1": glorot(keys[2], (hidden, hidden)),
        "b1": jax.random.uniform(keys[3], (1, hidden), jnp.float32, -0.1, 0.1),
        "w2": glorot(keys[4], (hidden, hidden)),
        "b2": jax.random.uniform(keys[5], (1, hidden), jnp.float32, -0.1, 0.1),
        "wa": glorot(keys[6], (hidden, alloc_size)),
        "ba": jax.random.uniform(keys[7], (1, alloc_size), jnp.float32, -0.1, 0.1),
        "wp": glorot(keys[8], (hidden, n_agents)),
        "bp": jax.random.uniform(keys[9], (1, n_agents), jnp.float32, -0.1, 0.1),
    }


def reference_forward(reports, params, n_agents, n_items):
    """Pure-JAX reference mirroring the PyTorch module."""
    B = reports.shape[0]
    A, I = n_agents, n_items
    x = reports.reshape(B, A * I)
    h = jnp.tanh(x @ params["w0"] + params["b0"])
    h = jnp.tanh(h @ params["w1"] + params["b1"])
    h = jnp.tanh(h @ params["w2"] + params["b2"])
    alloc = (h @ params["wa"] + params["ba"]).reshape(B, A + 1, I)
    alloc = jax.nn.softmax(alloc, axis=1)[:, :-1, :]          # View_Cut
    pay = jax.nn.sigmoid(h @ params["wp"] + params["bp"])
    payments = pay * jnp.sum(alloc * reports, axis=2)
    return alloc, payments


if __name__ == "__main__":
    n_agents, n_items, hidden, batch = 4, 4, 32, 8

    key = jax.random.PRNGKey(0)
    k_params, k_reports, k_big = jax.random.split(key, 3)
    params = make_params(k_params, n_agents, n_items, hidden)
    reports = jax.random.uniform(k_reports, (batch, n_agents, n_items), jnp.float32)

    # Small single-tile check (batch padded to one 128-lane tile).
    allocs, payments = regret_net_forward(reports, params, n_agents, n_items)
    allocs = jax.block_until_ready(allocs)
    payments = jax.block_until_ready(payments)
    ref_allocs, ref_payments = reference_forward(reports, params, n_agents, n_items)
    assert allocs.shape == (batch, n_agents, n_items)
    assert payments.shape == (batch, n_agents)
    assert jnp.allclose(allocs, ref_allocs, atol=1e-5, rtol=1e-5)
    assert jnp.allclose(payments, ref_payments, atol=1e-5, rtol=1e-5)

    # Multi-tile + padding check (>=2 parallel grid steps, resident weights).
    big_b = 200
    reports_big = jax.random.uniform(k_big, (big_b, n_agents, n_items), jnp.float32)
    allocs_b, payments_b = regret_net_forward(reports_big, params, n_agents, n_items)
    allocs_b = jax.block_until_ready(allocs_b)
    payments_b = jax.block_until_ready(payments_b)
    ref_allocs_b, ref_payments_b = reference_forward(reports_big, params,
                                                     n_agents, n_items)
    assert allocs_b.shape == (big_b, n_agents, n_items)
    assert payments_b.shape == (big_b, n_agents)
    assert jnp.allclose(allocs_b, ref_allocs_b, atol=1e-5, rtol=1e-5)
    assert jnp.allclose(payments_b, ref_payments_b, atol=1e-5, rtol=1e-5)

    print("KERNEL_OK")
</pallas_src>

<mosaic_0001>
module attributes {stable_mosaic.version = 11 : i64} {
  func.func @_regret_kernel(%arg0: i32, %arg1: memref<16x128xf32, #tpu.memory_space<vmem>>, %arg2: memref<32x16xf32, #tpu.memory_space<vmem>>, %arg3: memref<92x32xf32, #tpu.memory_space<vmem>>, %arg4: memref<124x1xf32, #tpu.memory_space<vmem>>, %arg5: memref<20x4xf32, #tpu.memory_space<vmem>>, %arg6: memref<4x16xf32, #tpu.memory_space<vmem>>, %arg7: memref<20x128xf32, #tpu.memory_space<vmem>>) attributes {dimension_semantics = [#tpu.dimension_semantics<parallel>], iteration_bounds = array<i64: 1>, scalar_prefetch = 0 : i64, scratch_operands = 0 : i64, tpu.core_type = #tpu.core_type<tc>, window_params = [{transform_indices = @transform_0, window_bounds = array<i64: 16, 128>}, {pipeline_mode = #tpu.pipeline_mode<synchronous>, transform_indices = @transform_1, window_bounds = array<i64: 32, 16>}, {pipeline_mode = #tpu.pipeline_mode<synchronous>, transform_indices = @transform_2, window_bounds = array<i64: 92, 32>}, {pipeline_mode = #tpu.pipeline_mode<synchronous>, transform_indices = @transform_3, window_bounds = array<i64: 124, 1>}, {pipeline_mode = #tpu.pipeline_mode<synchronous>, transform_indices = @transform_4, window_bounds = array<i64: 20, 4>}, {pipeline_mode = #tpu.pipeline_mode<synchronous>, transform_indices = @transform_5, window_bounds = array<i64: 4, 16>}, {transform_indices = @transform_6, window_bounds = array<i64: 20, 128>}]} {
    %c0 = arith.constant 0 : index
    %c0_0 = arith.constant 0 : index
    %0 = vector.load %arg1[%c0, %c0_0] : memref<16x128xf32, #tpu.memory_space<vmem>>, vector<16x128xf32>
    %c0_1 = arith.constant 0 : index
    %c0_2 = arith.constant 0 : index
    %1 = vector.load %arg4[%c0_1, %c0_2] : memref<124x1xf32, #tpu.memory_space<vmem>>, vector<32x1xf32>
    %c32 = arith.constant 32 : index
    %c0_3 = arith.constant 0 : index
    %2 = vector.load %arg4[%c32, %c0_3] : memref<124x1xf32, #tpu.memory_space<vmem>>, vector<32x1xf32>
    %c64 = arith.constant 64 : index
    %c0_4 = arith.constant 0 : index
    %3 = vector.load %arg4[%c64, %c0_4] : memref<124x1xf32, #tpu.memory_space<vmem>>, vector<32x1xf32>
    %c96 = arith.constant 96 : index
    %c0_5 = arith.constant 0 : index
    %4 = vector.load %arg4[%c96, %c0_5] : memref<124x1xf32, #tpu.memory_space<vmem>>, vector<28x1xf32>
    %c0_6 = arith.constant 0 : index
    %c0_7 = arith.constant 0 : index
    %5 = vector.load %arg2[%c0_6, %c0_7] : memref<32x16xf32, #tpu.memory_space<vmem>>, vector<32x16xf32>
    %cst = arith.constant dense<0.000000e+00> : vector<32x128xf32>
    %6 = tpu.matmul %5, %0, %cst {dimension_numbers = #tpu.dot_dimension_numbers<[1], [0], [0], [1], [0, 0, 1, 1], [], []>} : vector<32x16xf32>, vector<16x128xf32>, vector<32x128xf32> -> vector<32x128xf32>
    %7 = vector.broadcast %1 : vector<32x1xf32> to vector<32x128xf32>
    %8 = arith.addf %6, %7 : vector<32x128xf32>
    %9 = math.tanh %8 : vector<32x128xf32>
    %c0_8 = arith.constant 0 : index
    %c0_9 = arith.constant 0 : index
    %10 = vector.load %arg3[%c0_8, %c0_9] : memref<92x32xf32, #tpu.memory_space<vmem>>, vector<32x32xf32>
    %cst_10 = arith.constant dense<0.000000e+00> : vector<32x128xf32>
    %11 = tpu.matmul %10, %9, %cst_10 {dimension_numbers = #tpu.dot_dimension_numbers<[1], [0], [0], [1], [0, 0, 1, 1], [], []>} : vector<32x32xf32>, vector<32x128xf32>, vector<32x128xf32> -> vector<32x128xf32>
    %12 = vector.broadcast %2 : vector<32x1xf32> to vector<32x128xf32>
    %13 = arith.addf %11, %12 : vector<32x128xf32>
    %14 = math.tanh %13 : vector<32x128xf32>
    %c32_11 = arith.constant 32 : index
    %c0_12 = arith.constant 0 : index
    %15 = vector.load %arg3[%c32_11, %c0_12] : memref<92x32xf32, #tpu.memory_space<vmem>>, vector<32x32xf32>
    %cst_13 = arith.constant dense<0.000000e+00> : vector<32x128xf32>
    %16 = tpu.matmul %15, %14, %cst_13 {dimension_numbers = #tpu.dot_dimension_numbers<[1], [0], [0], [1], [0, 0, 1, 1], [], []>} : vector<32x32xf32>, vector<32x128xf32>, vector<32x128xf32> -> vector<32x128xf32>
    %17 = vector.broadcast %3 : vector<32x1xf32> to vector<32x128xf32>
    %18 = arith.addf %16, %17 : vector<32x128xf32>
    %19 = math.tanh %18 : vector<32x128xf32>
    %c64_14 = arith.constant 64 : index
    %c0_15 = arith.constant 0 : index
    %20 = vector.load %arg3[%c64_14, %c0_15] : memref<92x32xf32, #tpu.memory_space<vmem>>, vector<28x32xf32>
    %cst_16 = arith.constant dense<0.000000e+00> : vector<28x128xf32>
    %21 = tpu.matmul %20, %19, %cst_16 {dimension_numbers = #tpu.dot_dimension_numbers<[1], [0], [0], [1], [0, 0, 1, 1], [], []>} : vector<28x32xf32>, vector<32x128xf32>, vector<28x128xf32> -> vector<28x128xf32>
    %22 = vector.broadcast %4 : vector<28x1xf32> to vector<28x128xf32>
    %23 = arith.addf %21, %22 : vector<28x128xf32>
    %24 = vector.extract_strided_slice %23 {offsets = [0, 0], sizes = [20, 128], strides = [1, 1]} : vector<28x128xf32> to vector<20x128xf32>
    %25 = vector.extract_strided_slice %23 {offsets = [24, 0], sizes = [4, 128], strides = [1, 1]} : vector<28x128xf32> to vector<4x128xf32>
    %26 = vector.extract_strided_slice %23 {offsets = [0, 0], sizes = [4, 128], strides = [1, 1]} : vector<28x128xf32> to vector<4x128xf32>
    %27 = vector.extract_strided_slice %23 {offsets = [4, 0], sizes = [4, 128], strides = [1, 1]} : vector<28x128xf32> to vector<4x128xf32>
    %28 = arith.maximumf %26, %27 : vector<4x128xf32>
    %29 = vector.extract_strided_slice %23 {offsets = [8, 0], sizes = [4, 128], strides = [1, 1]} : vector<28x128xf32> to vector<4x128xf32>
    %30 = arith.maximumf %28, %29 : vector<4x128xf32>
    %31 = vector.extract_strided_slice %23 {offsets = [12, 0], sizes = [4, 128], strides = [1, 1]} : vector<28x128xf32> to vector<4x128xf32>
    %32 = arith.maximumf %30, %31 : vector<4x128xf32>
    %33 = vector.extract_strided_slice %23 {offsets = [16, 0], sizes = [4, 128], strides = [1, 1]} : vector<28x128xf32> to vector<4x128xf32>
    %34 = arith.maximumf %32, %33 : vector<4x128xf32>
    %c0_17 = arith.constant 0 : index
    %c0_18 = arith.constant 0 : index
    %35 = vector.load %arg5[%c0_17, %c0_18] : memref<20x4xf32, #tpu.memory_space<vmem>>, vector<20x4xf32>
    %cst_19 = arith.constant dense<0.000000e+00> : vector<20x128xf32>
    %36 = tpu.matmul %35, %34, %cst_19 {dimension_numbers = #tpu.dot_dimension_numbers<[1], [0], [0], [1], [0, 0, 1, 1], [], []>} : vector<20x4xf32>, vector<4x128xf32>, vector<20x128xf32> -> vector<20x128xf32>
    %37 = arith.subf %24, %36 : vector<20x128xf32>
    %38 = math.exp %37 : vector<20x128xf32>
    %39 = vector.extract_strided_slice %38 {offsets = [0, 0], sizes = [4, 128], strides = [1, 1]} : vector<20x128xf32> to vector<4x128xf32>
    %40 = vector.extract_strided_slice %38 {offsets = [4, 0], sizes = [4, 128], strides = [1, 1]} : vector<20x128xf32> to vector<4x128xf32>
    %41 = arith.addf %39, %40 : vector<4x128xf32>
    %42 = vector.extract_strided_slice %38 {offsets = [8, 0], sizes = [4, 128], strides = [1, 1]} : vector<20x128xf32> to vector<4x128xf32>
    %43 = arith.addf %41, %42 : vector<4x128xf32>
    %44 = vector.extract_strided_slice %38 {offsets = [12, 0], sizes = [4, 128], strides = [1, 1]} : vector<20x128xf32> to vector<4x128xf32>
    %45 = arith.addf %43, %44 : vector<4x128xf32>
    %46 = vector.extract_strided_slice %38 {offsets = [16, 0], sizes = [4, 128], strides = [1, 1]} : vector<20x128xf32> to vector<4x128xf32>
    %47 = arith.addf %45, %46 : vector<4x128xf32>
    %cst_20 = arith.constant 1.000000e+00 : f32
    %48 = vector.broadcast %cst_20 : f32 to vector<4x128xf32>
    %49 = arith.divf %48, %47 : vector<4x128xf32>
    %c0_21 = arith.constant 0 : index
    %c0_22 = arith.constant 0 : index
    %50 = vector.load %arg5[%c0_21, %c0_22] : memref<20x4xf32, #tpu.memory_space<vmem>>, vector<16x4xf32>
    %cst_23 = arith.constant dense<0.000000e+00> : vector<16x128xf32>
    %51 = tpu.matmul %50, %49, %cst_23 {dimension_numbers = #tpu.dot_dimension_numbers<[1], [0], [0], [1], [0, 0, 1, 1], [], []>} : vector<16x4xf32>, vector<4x128xf32>, vector<16x128xf32> -> vector<16x128xf32>
    %52 = vector.extract_strided_slice %38 {offsets = [0, 0], sizes = [16, 128], strides = [1, 1]} : vector<20x128xf32> to vector<16x128xf32>
    %53 = arith.mulf %52, %51 : vector<16x128xf32>
    %c0_24 = arith.constant 0 : index
    %c0_25 = arith.constant 0 : index
    %54 = vector.load %arg7[%c0_24, %c0_25] : memref<20x128xf32, #tpu.memory_space<vmem>>, vector<16x128xf32>
    tpu.vector_store %arg7[%c0_24, %c0_25], %53 {strides = array<i32>} : memref<20x128xf32, #tpu.memory_space<vmem>>, vector<16x128xf32>,
    %c0_26 = arith.constant 0 : index
    %c0_27 = arith.constant 0 : index
    %55 = vector.load %arg6[%c0_26, %c0_27] : memref<4x16xf32, #tpu.memory_space<vmem>>, vector<4x16xf32>
    %56 = arith.mulf %53, %0 : vector<16x128xf32>
    %cst_28 = arith.constant dense<0.000000e+00> : vector<4x128xf32>
    %57 = tpu.matmul %55, %56, %cst_28 {dimension_numbers = #tpu.dot_dimension_numbers<[1], [0], [0], [1], [0, 0, 1, 1], [], []>} : vector<4x16xf32>, vector<16x128xf32>, vector<4x128xf32> -> vector<4x128xf32>
    %58 = arith.negf %25 : vector<4x128xf32>
    %59 = math.exp %58 : vector<4x128xf32>
    %cst_29 = arith.constant 1.000000e+00 : f32
    %60 = vector.broadcast %cst_29 : f32 to vector<4x128xf32>
    %61 = arith.addf %60, %59 : vector<4x128xf32>
    %62 = arith.divf %60, %61 : vector<4x128xf32>
    %63 = arith.mulf %62, %57 : vector<4x128xf32>
    %c16 = arith.constant 16 : index
    %c0_30 = arith.constant 0 : index
    %64 = vector.load %arg7[%c16, %c0_30] : memref<20x128xf32, #tpu.memory_space<vmem>>, vector<4x128xf32>
    tpu.vector_store %arg7[%c16, %c0_30], %63 {strides = array<i32>} : memref<20x128xf32, #tpu.memory_space<vmem>>, vector<4x128xf32>,
    return
  }
  func.func @transform_0(%arg0: i32) -> (i32, i32) {
    %c0_i32 = arith.constant 0 : i32
    %c0_i32_0 = arith.constant 0 : i32
    return %c0_i32, %arg0 : i32, i32
  }
  func.func @transform_1(%arg0: i32) -> (i32, i32) {
    %c0_i32 = arith.constant 0 : i32
    %c0_i32_0 = arith.constant 0 : i32
    %c0_i32_1 = arith.constant 0 : i32
    return %c0_i32, %c0_i32_0 : i32, i32
  }
  func.func @transform_2(%arg0: i32) -> (i32, i32) {
    %c0_i32 = arith.constant 0 : i32
    %c0_i32_0 = arith.constant 0 : i32
    %c0_i32_1 = arith.constant 0 : i32
    return %c0_i32, %c0_i32_0 : i32, i32
  }
  func.func @transform_3(%arg0: i32) -> (i32, i32) {
    %c0_i32 = arith.constant 0 : i32
    %c0_i32_0 = arith.constant 0 : i32
    %c0_i32_1 = arith.constant 0 : i32
    return %c0_i32, %c0_i32_0 : i32, i32
  }
  func.func @transform_4(%arg0: i32) -> (i32, i32) {
    %c0_i32 = arith.constant 0 : i32
    %c0_i32_0 = arith.constant 0 : i32
    %c0_i32_1 = arith.constant 0 : i32
    return %c0_i32, %c0_i32_0 : i32, i32
  }
  func.func @transform_5(%arg0: i32) -> (i32, i32) {
    %c0_i32 = arith.constant 0 : i32
    %c0_i32_0 = arith.constant 0 : i32
    %c0_i32_1 = arith.constant 0 : i32
    return %c0_i32, %c0_i32_0 : i32, i32
  }
  func.func @transform_6(%arg0: i32) -> (i32, i32) {
    %c0_i32 = arith.constant 0 : i32
    %c0_i32_0 = arith.constant 0 : i32
    return %c0_i32, %arg0 : i32, i32
  }
}

</mosaic_0001>

<bundles_post_ra>
// kernel: tpu_custom_call.1
= control target key start
LH: loop header
LB: loop body
LE: loop exit
PB: predicated region body
PF: predicated region fallthrough
CT: control target
= control target key end

     0   :  { %vm66_vm0 = vcmask 130048   ;;  %v1064_v4 = vmov 0   ;;  %s1271_s0 = inlined_call_operand.vmem [shape: f32[16,128], index: 0, kind: input, shape index: {}]   ;;  %s1272_s1 = inlined_call_operand.vmem [shape: f32[32,16], index: 1, kind: input, shape index: {}]   ;;  %s1273_s2 = inlined_call_operand.vmem [shape: f32[92,32], index: 2, kind: input, shape index: {}]   ;;  %s1274_s3 = inlined_call_operand.vmem [shape: f32[124,1], index: 3, kind: input, shape index: {}]   ;;  %s1275_s4 = inlined_call_operand.vmem [shape: f32[20,4], index: 4, kind: input, shape index: {}]   ;;  %s1276_s5 = inlined_call_operand.vmem [shape: f32[4,16], index: 5, kind: input, shape index: {}]   ;;  %s1277_s6 = inlined_call_operand.hbm [shape: f32[20,128], index: 6, kind: output, shape index: {}]  }
   0x1   :  { %v1108_v0 = vld [vmem:[%s1271_s0 + $0x8] sm:$0xff]  ;;  %v1113_v1 = vld [vmem:[%s1271_s0] sm:$0xff]  ;;  %1004 = vset.pattern.permute.xlu0 %v1064_v4  ;;  %v29_v5 = vld [vmem:[%s1274_s3 + $0x18] sm:$0xff]  ;;  %1005 = vset.pattern.permute.xlu1 %v1064_v4 }
   0x2   :  { %v42_v2 = vld [vmem:[%s1272_s1] sm:$0xff]  ;;  %923 = vmatprep.subr.mxu0 %v1108_v0  ;;  %v43_v3 = vld [vmem:[%s1272_s1 + $0x8] sm:$0xff]  ;;  %v44_v7 = vld [vmem:[%s1272_s1 + $0x10] sm:$0xff]  ;;  %63 = vperm.xlu0 %1004, %v29_v5  }
   0x3   :  { %927 = vmatprep.mubr.msk.f32.mxu0 %vm66_vm0, %v42_v2  ;;  %924 = vmatpush3.msra.mxu0 %v1108_v0  ;;  %v27_v6 = vld [vmem:[%s1274_s3 + $0x8] sm:$0xff]  ;;  %v28_v8 = vld [vmem:[%s1274_s3 + $0x10] sm:$0xff]  ;;  %v45_v9 = vld [vmem:[%s1272_s1 + $0x18] sm:$0xff] }
   0x4   :  { %925 = vmatprep.subr.mxu0 %v1113_v1  ;;  %53 = vperm.xlu1 %1005, %v27_v6   ;;  %v26_v10 = vld [vmem:[%s1274_s3] sm:$0xff] }
   0x5   :  { %926 = vmatpush3.msra.mxu0 %v1113_v1 }
   0x6   :  { %928 = vmatmul.mubr.msk.f32.vlgmr.msra.gmra.mxu0 %vm66_vm0, %v43_v3  ;;  %58 = vperm.xlu0 %1004, %v28_v8  }
   0x7   :  { %930 = vmatprep.mubr.msk.f32.mxu0 %vm66_vm0, %v44_v7 }
   0x8   :  { %11 = vsyncpa [#allocation3], 0  ;;  %v33_v11 = vld [vmem:[%s1274_s3 + $0x38] sm:$0xff]  ;;  %48 = vperm.xlu1 %1005, %v26_v10   ;;  %v32_v12 = vld [vmem:[%s1274_s3 + $0x30] sm:$0xff]  ;;  %vm192_vm1 = vcmask 261120   ;;  %vm1066_vm2 = vmmov 0  }
   0x9   :  { %v31_v13 = vld [vmem:[%s1274_s3 + $0x28] sm:$0xff]  ;;  %v30_v14 = vld [vmem:[%s1274_s3 + $0x20] sm:$0xff]  ;;  %v37_v15 = vld [vmem:[%s1274_s3 + $0x58] sm:$0xff]  ;;  %vm553_vm3 = vcmask 31744   ;;  %vm563_vm4 = vcmask 1043456   ;;  %s1067_s16 = smov [#allocation2]  }
   0xa   :  { %931 = vmatmul.mubr.msk.f32.gmra.mxu0 %vm66_vm0, %v45_v9  ;;  %189 = vperm.xlu0 %1004, %v33_v11   ;;  %v36_v16 = vld [vmem:[%s1274_s3 + $0x50] sm:$0xff]  ;;  %v35_v17 = vld [vmem:[%s1274_s3 + $0x48] sm:$0xff]  ;;  %v34_v18 = vld [vmem:[%s1274_s3 + $0x40] sm:$0xff]  ;;  %s847_s17 = sshll.u32 %s1067_s16, 4  ;;  %s848_s17 = int_to_ptr.vmem [resolvable:$true] %s847_s17 }
   0xb   :  { %v38_v19 = vld [vmem:[%s1274_s3 + $0x60] sm:$0xff]  ;;  %v39_v20 = vld [vmem:[%s1274_s3 + $0x68] sm:$0xff]  ;;  %v40_v21 = vld [vmem:[%s1274_s3 + $0x70] sm:$0xff]  ;;  %p1047_p1 = scmp.lt.s32.totalorder %s848_s17, %s848_s17 }
   0xc   :  { %184 = vperm.xlu1 %1005, %v32_v12   ;;  %v41_v22 = vld [vmem:[%s1274_s3 + $0x78] sm:$0xf]  ;;  %v168_v23 = vld [vmem:[%s1273_s2] sm:$0xff]  ;;  %v169_v40 = vld [vmem:[%s1273_s2 + $0x8] sm:$0xff] }
   0xd   :  { %941 = vmatprep.mubr.msk.f32.mxu1 %vm192_vm1, %v168_v23  ;;  %v170_v41 = vld [vmem:[%s1273_s2 + $0x10] sm:$0xff]  ;;  %v171_v42 = vld [vmem:[%s1273_s2 + $0x18] sm:$0xff]  ;;  %v294_v43 = vld [vmem:[%s1273_s2 + $0x20] sm:$0xff] }
   0xe   :  { %179 = vperm.xlu0 %1004, %v31_v13   ;;  %955 = vmatprep.mubr.msk.f32.mxu0 %vm192_vm1, %v294_v43  ;;  %v295_v60 = vld [vmem:[%s1273_s2 + $0x28] sm:$0xff]  ;;  %v296_v61 = vld [vmem:[%s1273_s2 + $0x30] sm:$0xff]  ;;  %v297_v62 = vld [vmem:[%s1273_s2 + $0x38] sm:$0xff] }
   0xf   :  { %v419_v63 = vld [vmem:[%s1273_s2 + $0x40] sm:$0xff] }
  0x10   :  { %174 = vperm.xlu1 %1005, %v30_v14  }
  0x12   :  { %315 = vperm.xlu0 %1004, %v37_v15  }
  0x14   :  { %310 = vperm.xlu1 %1005, %v36_v16  }
  0x16   :  { %305 = vperm.xlu0 %1004, %v35_v17  }
  0x18   :  { %300 = vperm.xlu1 %1005, %v34_v18   ;;  %v420_v18 = vld [vmem:[%s1273_s2 + $0x48] sm:$0xff] }
  0x1a   :  { %425 = vperm.xlu0 %1004, %v38_v19   ;;  %v421_v19 = vld [vmem:[%s1273_s2 + $0x50] sm:$0xff] }
  0x1c   :  { %430 = vperm.xlu1 %1005, %v39_v20   ;;  %v422_v20 = vld [vmem:[%s1273_s2 + $0x58] sm:$0xf] }
  0x1e   :  { %435 = vperm.xlu0 %1004, %v40_v21   ;;  %v1065_v21 = vmov 0.0  }
  0x20   :  { %440 = vperm.xlu1 %1005, %v41_v22   ;;  %v550_v22 = vld [vmem:[%s1275_s4] sm:$0xff] }
  0x7d   :  { %v64_v24 = vpop.permute.xlu0 %63 }
  0x7f   :  { %v54_v26 = vpop.permute.xlu1 %53 }
  0x81   :  { %v59_v30 = vpop.permute.xlu0 %58 }
  0x83   :  { %v49_v34 = vpop.permute.xlu1 %48 }
  0x85   :  { %v190_v44 = vpop.permute.xlu0 %189 }
  0x87   :  { %v185_v46 = vpop.permute.xlu1 %184 }
  0x89   :  { %v180_v50 = vpop.permute.xlu0 %179 }
  0x8b   :  { %v175_v54 = vpop.permute.xlu1 %174 }
  0x8d   :  { %v316_v2 = vpop.permute.xlu0 %315 }
  0x8f   :  { %v311_v4 = vpop.permute.xlu1 %310 }
  0x91   :  { %v306_v8 = vpop.permute.xlu0 %305 }
  0x93   :  { %v301_v12 = vpop.permute.xlu1 %300 }
  0xc6   :  { %v929_v25 = vpop.f32.mrf.mxu0 }
  0xc7   :  { %v151_v32 = vadd.f32 %v929_v25, %v54_v26 }
  0xc8   :  { %v145_v27 = vpop.f32.mrf.mxu0 }
  0xc9   :  { %v146_v35 = vadd.f32 %v145_v27, %v49_v34  ;;  %v431_v27 = vpop.permute.xlu1 %430 }
  0xca   :  { %v932_v28 = vpop.f32.mrf.mxu0 }
  0xcb   :  { %v161_v29 = vadd.f32 %v932_v28, %v64_v24  ;;  %v426_v24 = vpop.permute.xlu0 %425 }
  0xcc   :  { %v155_v31 = vpop.f32.mrf.mxu0 }
  0xcd   :  { %1006 = vtanh.f32 %v161_v29  ;;  %v156_v33 = vadd.f32 %v155_v31, %v59_v30 }
  0xcf   :  { %1008 = vtanh.f32 %v156_v33 }
  0xd0   :  { %1010 = vtanh.f32 %v151_v32 }
  0xd1   :  { %1012 = vtanh.f32 %v146_v35  ;;  %v436_v35 = vpop.permute.xlu0 %435 }
  0xda   :  { %v1007_v36 = vpop.eup %1006 }
  0xdb   :  { %933 = vmatprep.subr.mxu1 %v1007_v36 }
  0xdc   :  { %v1009_v37 = vpop.eup %1008  ;;  %934 = vmatpush3.msra.mxu1 %v1007_v36 }
  0xdd   :  { %935 = vmatprep.subr.mxu1 %v1009_v37  ;;  %v1011_v38 = vpop.eup %1010 }
  0xde   :  { %936 = vmatpush3.msra.mxu1 %v1009_v37  ;;  %v1013_v39 = vpop.eup %1012 }
  0xdf   :  { %937 = vmatprep.subr.mxu1 %v1011_v38 }
  0xe0   :  { %938 = vmatpush3.msra.mxu1 %v1011_v38 }
  0xe1   :  { %939 = vmatprep.subr.mxu1 %v1013_v39 }
  0xe2   :  { %940 = vmatpush3.msra.mxu1 %v1013_v39  ;;  %v551_v39 = vld [vmem:[%s1275_s4 + $0x8] sm:$0xff] }
  0xe3   :  { %942 = vmatmul.mubr.msk.f32.vlgmr.msra.gmra.mxu1 %vm192_vm1, %v169_v40  ;;  %v552_v40 = vld [vmem:[%s1275_s4 + $0x10] sm:$0xf] }
  0xe4   :  { %944 = vmatprep.mubr.msk.f32.mxu1 %vm192_vm1, %v170_v41 }
  0xe7   :  { %945 = vmatmul.mubr.msk.f32.gmra.mxu1 %vm192_vm1, %v171_v42 }
  0xe8   :  { %969 = vmatprep.mubr.msk.f32.mxu1 %vm192_vm1, %v419_v63 }
 0x1a3   :  { %v943_v45 = vpop.f32.mrf.mxu1 }
 0x1a4   :  { %v277_v52 = vadd.f32 %v943_v45, %v180_v50 }
 0x1a5   :  { %v271_v47 = vpop.f32.mrf.mxu1 }
 0x1a6   :  { %v272_v55 = vadd.f32 %v271_v47, %v175_v54 }
 0x1a7   :  { %v946_v48 = vpop.f32.mrf.mxu1 }
 0x1a8   :  { %v287_v49 = vadd.f32 %v946_v48, %v190_v44 }
 0x1a9   :  { %v281_v51 = vpop.f32.mrf.mxu1 }
 0x1aa   :  { %1014 = vtanh.f32 %v287_v49  ;;  %v282_v53 = vadd.f32 %v281_v51, %v185_v46 }
 0x1ac   :  { %1016 = vtanh.f32 %v282_v53 }
 0x1ad   :  { %1018 = vtanh.f32 %v277_v52 }
 0x1ae   :  { %1020 = vtanh.f32 %v272_v55 }
 0x1b7   :  { %v1015_v56 = vpop.eup %1014 }
 0x1b8   :  { %947 = vmatprep.subr.mxu0 %v1015_v56 }
 0x1b9   :  { %v1017_v57 = vpop.eup %1016  ;;  %948 = vmatpush3.msra.mxu0 %v1015_v56 }
 0x1ba   :  { %949 = vmatprep.subr.mxu0 %v1017_v57  ;;  %v1019_v58 = vpop.eup %1018 }
 0x1bb   :  { %950 = vmatpush3.msra.mxu0 %v1017_v57  ;;  %v1021_v59 = vpop.eup %1020 }
 0x1bc   :  { %951 = vmatprep.subr.mxu0 %v1019_v58 }
 0x1bd   :  { %952 = vmatpush3.msra.mxu0 %v1019_v58 }
 0x1be   :  { %953 = vmatprep.subr.mxu0 %v1021_v59 }
 0x1bf   :  { %954 = vmatpush3.msra.mxu0 %v1021_v59 }
 0x1c0   :  { %956 = vmatmul.mubr.msk.f32.vlgmr.msra.gmra.mxu0 %vm192_vm1, %v295_v60  ;;  %975 = vmatprep.subr.mxu0 %v1065_v21 }
 0x1c1   :  { %958 = vmatprep.mubr.msk.f32.mxu0 %vm192_vm1, %v296_v61 }
 0x1c4   :  { %959 = vmatmul.mubr.msk.f32.gmra.mxu0 %vm192_vm1, %v297_v62 }
 0x1c5   :  { %977 = vmatprep.mubr.msk.f32.mxu0 %vm1066_vm2, %v1065_v21 }
 0x280   :  { %v957_v3 = vpop.f32.mrf.mxu0 }
 0x281   :  { %v402_v10 = vadd.f32 %v957_v3, %v306_v8  ;;  %v441_v8 = vpop.permute.xlu1 %440 }
 0x282   :  { %v396_v5 = vpop.f32.mrf.mxu0 }
 0x283   :  { %v397_v13 = vadd.f32 %v396_v5, %v301_v12 }
 0x284   :  { %v960_v6 = vpop.f32.mrf.mxu0 }
 0x285   :  { %v412_v7 = vadd.f32 %v960_v6, %v316_v2 }
 0x286   :  { %v406_v9 = vpop.f32.mrf.mxu0 }
 0x287   :  { %1022 = vtanh.f32 %v412_v7  ;;  %v407_v11 = vadd.f32 %v406_v9, %v311_v4  ;;  %v758_v7 = vld [vmem:[%s1276_s5] sm:$0xf]  ;;  %s1042_s5 = scalar_lea.vmem %s848_s17, 384 }
 0x288   :  { %p1043_p0 = scmp.ne.s32.totalorder %s848_s17, %s1042_s5  ;;  %p1048_p2 = scmp.lt.s32.totalorder %s1042_s5, %s1042_s5 }
 0x289   :  { %1024 = vtanh.f32 %v407_v11 }
 0x28a   :  { %1026 = vtanh.f32 %v402_v10  ;;  %p1049_p3 = por %p1048_p2, %p1047_p1 }
 0x28b   :  { %1028 = vtanh.f32 %v397_v13 }
 0x28c   :  { %p1050_p4 = pnand %p1049_p3, %p1043_p0 }
 0x294   :  { %v1023_v14 = vpop.eup %1022 }
 0x295   :  { %961 = vmatprep.subr.mxu1 %v1023_v14 }
 0x296   :  { %v1025_v15 = vpop.eup %1024  ;;  %962 = vmatpush3.msra.mxu1 %v1023_v14 }
 0x297   :  { %963 = vmatprep.subr.mxu1 %v1025_v15  ;;  %v1027_v16 = vpop.eup %1026 }
 0x298   :  { %964 = vmatpush3.msra.mxu1 %v1025_v15  ;;  %v1029_v17 = vpop.eup %1028 }
 0x299   :  { %965 = vmatprep.subr.mxu1 %v1027_v16 }
 0x29a   :  { %966 = vmatpush3.msra.mxu1 %v1027_v16 }
 0x29b   :  { %967 = vmatprep.subr.mxu1 %v1029_v17 }
 0x29c   :  { %968 = vmatpush3.msra.mxu1 %v1029_v17 }
 0x29d   :  { %970 = vmatmul.mubr.msk.f32.vlgmr.msra.gmra.mxu1 %vm192_vm1, %v420_v18 }
 0x29e   :  { %972 = vmatprep.mubr.msk.f32.mxu1 %vm192_vm1, %v421_v19 }
 0x2a1   :  { %973 = vmatmul.mubr.msk.f32.gmra.mxu1 %vm192_vm1, %v422_v20 }
 0x2a2   :  { %988 = vmatprep.mubr.msk.f32.mxu1 %vm553_vm3, %v550_v22 }
 0x35d   :  { %v971_v23 = vpop.f32.mrf.mxu1 }
 0x35e   :  { %v527_v29 = vadd.f32 %v971_v23, %v431_v27 }
 0x35f   :  { %v521_v25 = vpop.f32.mrf.mxu1 }
 0x360   :  { %v522_v26 = vadd.f32 %v521_v25, %v426_v24  ;;  %v546_v33 = vrot.slane %v527_v29, 4 }
 0x361   :  { %v1238_v28 = vpop.f32.mrf.mxu1 }
 0x362   :  { %v541_v30 = vrot.slane %v522_v26, 4  ;;  %v537_v9 = vadd.f32 %v1238_v28, %v441_v8 }
 0x363   :  { %v531_v32 = vpop.f32.mrf.mxu1 }
 0x364   :  { %v543_v31 = vmax.f32 %v522_v26, %v541_v30  ;;  %v532_v36 = vadd.f32 %v531_v32, %v436_v35  ;;  %v882_v10 = vmul.f32 -1.442695, %v537_v9 }
 0x366   :  { %v544_v34 = vmax.f32 %v543_v31, %v527_v29 }
 0x368   :  { %v548_v37 = vmax.f32 %v544_v34, %v546_v33 }
 0x36a   :  { %v549_v38 = vmax.f32 %v548_v37, %v532_v36 }
 0x36c   :  { %976 = vmatpush3.msk.msra.mxu0 %vm563_vm4, %v549_v38 }
 0x36d   :  { %978 = vmatmul.mubr.msk.f32.vlgmr.msra.gmra.mxu0 %vm553_vm3, %v550_v22 }
 0x36e   :  { %980 = vmatprep.mubr.msk.f32.mxu0 %vm1066_vm2, %v1065_v21 }
 0x371   :  { %981 = vmatmul.mubr.msk.f32.gmra.mxu0 %vm553_vm3, %v551_v39 }
 0x372   :  { %983 = vmatprep.mubr.msk.f32.mxu0 %vm1066_vm2, %v1065_v21 }
 0x375   :  { %984 = vmatmul.mubr.msk.f32.gmra.mxu0 %vm553_vm3, %v552_v40 }
 0x42d   :  { %v633_v41 = vpop.f32.mrf.mxu0 }
 0x42e   :  { %v647_v42 = vsub.f32 %v522_v26, %v633_v41 }
 0x42f   :  { %v979_v43 = vpop.f32.mrf.mxu0 }
 0x430   :  { %v650_v44 = vmul.f32 1.442695, %v647_v42 }
 0x431   :  { %v638_v45 = vpop.f32.mrf.mxu0 }
 0x432   :  { %1030 = vpow2.f32 %v650_v44  ;;  %v648_v46 = vsub.f32 %v527_v29, %v638_v45 }
 0x433   :  { %v982_v47 = vpop.f32.mrf.mxu0 }
 0x434   :  { %v652_v48 = vmul.f32 1.442695, %v648_v46 }
 0x435   :  { %v643_v49 = vpop.f32.mrf.mxu0 }
 0x436   :  { %1032 = vpow2.f32 %v652_v48  ;;  %v649_v50 = vsub.f32 %v532_v36, %v643_v49 }
 0x437   :  { %v985_v51 = vpop.f32.mrf.mxu0 }
 0x438   :  { %v654_v52 = vmul.f32 1.442695, %v649_v50 }
 0x43a   :  { %1034 = vpow2.f32 %v654_v52 }
 0x43f   :  { %v1031_v53 = vpop.eup %1030 }
 0x440   :  { %v657_v54 = vrot.slane %v1031_v53, 4 }
 0x442   :  { %v659_v55 = vadd.f32 %v1031_v53, %v657_v54 }
 0x443   :  { %v1033_v56 = vpop.eup %1032 }
 0x444   :  { %v660_v57 = vadd.f32 %v1033_v56, %v659_v55  ;;  %v662_v58 = vrot.slane %v1033_v56, 4 }
 0x446   :  { %v664_v59 = vadd.f32 %v662_v58, %v660_v57 }
 0x447   :  { %v1035_v60 = vpop.eup %1034 }
 0x448   :  { %v665_v61 = vadd.f32 %v1035_v60, %v664_v59 }
 0x44a   :  { %1036 = vrcp.f32 %v665_v61 }
 0x44b   :  { %1038 = vpow2.f32 %v882_v10 }
 0x457   :  { %v1037_v62 = vpop.eup %1036 }
 0x458   :  { %986 = vmatprep.subr.msk.mxu1 %vm563_vm4, %v1037_v62 }
 0x459   :  { %987 = vmatpush3.msk.msra.mxu1 %vm563_vm4, %v1037_v62 }
 0x45a   :  { %989 = vmatmul.mubr.msk.f32.vlgmr.msra.gmra.mxu1 %vm553_vm3, %v551_v39  ;;  %991 = vmatprep.subr.mxu1 %v1065_v21 }
 0x45b   :  { %995 = vmatprep.mubr.msk.f32.mxu1 %vm1066_vm2, %v1065_v21 }
 0x51a   :  { %v990_v63 = vpop.f32.mrf.mxu1 }
 0x51b   :  { %v755_v2 = vmul.f32 %v1033_v56, %v990_v63 }
 0x51c   :  { %v745_v3 = vpop.f32.mrf.mxu1 }
 0x51d   :  { %757 = vst [vmem:[#allocation2 + $0x8] sm:$0xff] %v755_v2  ;;  %v760_v4 = vmul.f32 %v755_v2, %v1108_v0  ;;  %v754_v5 = vmul.f32 %v1031_v53, %v745_v3  ;;  %v1039_v0 = vpop.eup %1038 }
 0x51e   :  { %v837_v11 = vadd.f32 1.0, %v1039_v0 }
 0x51f   :  { %756 = vst [vmem:[#allocation2] sm:$0xff] %v754_v5  ;;  %v759_v6 = vmul.f32 %v754_v5, %v1113_v1  ;;  %992 = vmatpush3.msra.mxu1 %v760_v4 }
 0x520   :  { %993 = vmatprep.subr.mxu1 %v1065_v21  ;;  %1040 = vrcp.f32 %v837_v11 }
 0x521   :  { %994 = vmatpush3.msra.mxu1 %v759_v6 }
 0x522   :  { %996 = vmatmul.mubr.msk.f32.vlgmr.msra.gmra.mxu1 %vm66_vm0, %v758_v7 }
 0x52d   :  { %v1041_v1 = vpop.eup %1040 }
 0x5e2   :  { %v830_v12 = vpop.f32.mrf.mxu1 }
 0x5e3   :  { %v840_v13 = vmul.f32 %v1041_v1, %v830_v12 }
 0x5e4   :  { %v997_v14 = vpop.f32.mrf.mxu1 }
 0x5e5   :  { %841 = vst [vmem:[#allocation2 + $0x10] sm:$0xf] %v840_v13 }
 0x5e6   :  { %1053 = shalt.err (!%p1050_p4)
}
 0x5e7   :  { %s1068_s18 = smov 128   ;;  %s1069_s19 = smov 8  }
 0x5e8   :  { %853 = dma.vmem_to_hbm [thread:$0]  %s848_s17, 384, %s1277_s6, [#allocation3], %s1068_s18, %s1068_s18, %s1069_s19  }
 0x5e9   :  { %1062 = dma.done.wait [#allocation3], 384  }
 0x5ea   :  { %1063 = vsyncadd [#allocation3], 4294966912 }
 0x5eb   :  { %857 = vsyncpa [#allocation3], 1 }

</bundles_post_ra>
